<compile_context>
chip_gen: v7x
topology: tpu7x:2x2x1
jax: 0.10.0
libtpu: 0.0.40
codegen_flags: <defaults>
</compile_context>

<pallas_src>
import functools

import jax
import jax.numpy as jnp
from jax import lax
from jax.experimental import pallas as pl
from jax.experimental.pallas import tpu as pltpu


_EPS = 1e-7
# T below this uses the transposed-compute ("cols") kernel so batch maps onto
# the 128-wide lane axis.  (Benchmark candidate: raising this toward ~512
# shifts the per-iteration reduction from the 2-wide XLU onto the 4-wide VPU
# on v6e/v7x; left at the lane width by default.)
_COLS_LAYOUT_MAX_T = 128


def _round_up(x, m):
    return ((x + m - 1) // m) * m


def _vmem_plan(itemsize):
    """Per-generation tile budget: (tile_elems, vmem_limit_bytes, min_grid_steps)."""
    try:
        vmem = int(pltpu.get_tpu_info().vmem_capacity_bytes)
    except Exception:
        vmem = 64 << 20                        # conservative: v7x per-core VMEM
    if vmem >= (96 << 20):                     # v5e / v6e: 128 MiB VMEM, 1 TC
        vmem_limit = 100 << 20
        min_steps = 1
    else:                                      # v7x: 64 MiB VMEM, 2 TCs/chip
        vmem_limit = 44 << 20
        min_steps = 4                          # let megacore shard the grid
    # Per-element VMEM cost: 2 io x double-buffered pipeline tiles in the
    # caller's dtype + ~6 live full-tile f32 temporaries in the top-k loop.
    per_elem = 4 * itemsize + 6 * 4
    tile_elems = (vmem_limit * 6 // 10) // per_elem
    return tile_elems, vmem_limit, min_steps


def _pick_batch_tile(B, row_elems, tile_elems, min_steps, align, floor):
    """Batch rows per tile: a multiple of `align`, or the full B (always legal)."""
    # TODO(synk): for row lengths so large that even `align` rows overflow the
    # VMEM budget (T >~ 400K on v7x) a multi-pass T-split would be needed.
    tb = max(align, (tile_elems // max(row_elems, 1)) // align * align)
    if min_steps > 1:
        # v7x: keep >= min_steps grid steps so both TensorCores get work, but
        # never shrink tiles below `floor` rows for it.
        tb = min(tb, max(floor, _round_up(pl.cdiv(B, min_steps), align)))
    if tb >= B:
        return B      # single full-extent block along batch
    return tb         # multiple of `align`; grid = cdiv, last block partial


def _kth_largest(x, axis, top_k):
    """top_k-th largest value per slice along `axis`, counted with multiplicity
    (== torch.topk(x, top_k, dim=axis)[0][..., -1]).

    Count-based extraction: each iteration knocks out ALL copies of the current
    maximum and tracks cumulative multiplicity; the answer is the max at the
    iteration where that count first reaches top_k.  No index iota and no
    tie-break select: per iteration just one max-reduce, one compare, one
    sum-reduce and one knockout select.
    """
    neg = jnp.float32(jnp.finfo(jnp.float32).min)
    rshape = list(x.shape)
    rshape[axis] = 1

    def body(_, carry):
        w, cnt, kth = carry
        m = jnp.max(w, axis=axis, keepdims=True)
        eq = w == m
        cnt_new = cnt + jnp.sum(eq.astype(jnp.float32), axis=axis, keepdims=True)
        kth = jnp.where((cnt < top_k) & (cnt_new >= top_k), m, kth)
        w = jnp.where(eq, neg, w)            # knock out every copy of the max
        return w, cnt_new, kth

    init = (x,
            jnp.zeros(tuple(rshape), jnp.float32),
            jnp.zeros(tuple(rshape), jnp.float32))
    # Cap the unroll factor so caller-supplied large top_k does not blow
    # vreg pressure / code size.
    _, _, kth = lax.fori_loop(0, top_k, body, init, unroll=min(top_k, 8))
    return kth


def _sparse_attn_kernel_rows(x_ref, o_ref, *, top_k):
    """Tile layout (TB, T): time on the lane axis (used when T >= 128)."""
    x = x_ref[...].astype(jnp.float32)
    kth = _kth_largest(x, axis=1, top_k=top_k)                  # (TB, 1)
    attn_w = jnp.maximum(x - (kth + _EPS), 0.0)                 # clamp(min=0)
    denom = jnp.sum(attn_w, axis=1, keepdims=True) + _EPS       # (TB, 1)
    inv = pl.reciprocal(denom, approx=False)
    o_ref[...] = (attn_w * inv).astype(o_ref.dtype)


def _sparse_attn_kernel_cols(x_ref, o_ref, *, top_k):
    """Tile layout (TL, T), T < 128: transpose in-kernel so batch is on lanes."""
    xt = jnp.transpose(x_ref[...].astype(jnp.float32))          # (T, TL) lane-dense
    kth = _kth_largest(xt, axis=0, top_k=top_k)                 # (1, TL)
    attn_w = jnp.maximum(xt - (kth + _EPS), 0.0)
    denom = jnp.sum(attn_w, axis=0, keepdims=True) + _EPS       # (1, TL)
    inv = pl.reciprocal(denom, approx=False)
    out_t = attn_w * inv                                        # (T, TL)
    o_ref[...] = jnp.transpose(out_t).astype(o_ref.dtype)       # back to (TL, T)


def _call_rows(x, top_k, tb_override=None):
    """T >= 128: keep (B, T) layout, tile the batch axis."""
    B, T = x.shape
    tile_elems, vmem_limit, min_steps = _vmem_plan(x.dtype.itemsize)
    tb = tb_override or _pick_batch_tile(B, T, tile_elems, min_steps,
                                         align=8, floor=256)
    grid = (pl.cdiv(B, tb),)
    return pl.pallas_call(
        functools.partial(_sparse_attn_kernel_rows, top_k=top_k),
        out_shape=jax.ShapeDtypeStruct((B, T), x.dtype),
        grid_spec=pltpu.PrefetchScalarGridSpec(
            num_scalar_prefetch=0,
            grid=grid,
            in_specs=[pl.BlockSpec((tb, T), lambda i: (i, 0))],
            out_specs=pl.BlockSpec((tb, T), lambda i: (i, 0)),
        ),
        compiler_params=pltpu.CompilerParams(
            dimension_semantics=("parallel",),
            vmem_limit_bytes=vmem_limit,
        ),
    )(x)


def _call_cols(x, top_k, tl_override=None):
    """T < 128: natural (B, T) blocks, in-kernel transpose for lane-dense compute."""
    B, T = x.shape
    tile_elems, vmem_limit, min_steps = _vmem_plan(x.dtype.itemsize)
    tl = tl_override or _pick_batch_tile(B, T, tile_elems, min_steps,
                                         align=128, floor=512)
    grid = (pl.cdiv(B, tl),)
    return pl.pallas_call(
        functools.partial(_sparse_attn_kernel_cols, top_k=top_k),
        out_shape=jax.ShapeDtypeStruct((B, T), x.dtype),
        grid_spec=pltpu.PrefetchScalarGridSpec(
            num_scalar_prefetch=0,
            grid=grid,
            in_specs=[pl.BlockSpec((tl, T), lambda i: (i, 0))],
            out_specs=pl.BlockSpec((tl, T), lambda i: (i, 0)),
        ),
        compiler_params=pltpu.CompilerParams(
            dimension_semantics=("parallel",),
            vmem_limit_bytes=vmem_limit,
        ),
    )(x)


def sparse_attention(attn_s, top_k=5, *, batch_tile=None):
    """Pallas forward pass of SparseAttention for a 2-D (batch, time) input.

    `batch_tile` (optional) forces the per-block batch size (testing hook to
    exercise the cdiv/partial-block path at small shapes).
    """
    top_k = top_k + 1                        # module's __init__ does top_k += 1
    B, T = attn_s.shape
    if T <= top_k:                           # static-shape branch, same as PyTorch
        return attn_s
    if T < _COLS_LAYOUT_MAX_T:
        return _call_cols(attn_s, top_k, tl_override=batch_tile)
    return _call_rows(attn_s, top_k, tb_override=batch_tile)


def _sparse_attention_ref(attn_s, top_k=5):
    """Pure-JAX reference (mirrors the PyTorch code) for validation."""
    top_k = top_k + 1
    T = attn_s.shape[1]
    if T <= top_k:
        return attn_s
    x = attn_s.astype(jnp.float32)
    delta = lax.top_k(x, top_k)[0][:, -1:] + _EPS
    attn_w = jnp.maximum(x - delta, 0.0)
    attn_w_sum = jnp.sum(attn_w, axis=1, keepdims=True) + _EPS
    return attn_w / attn_w_sum


if __name__ == "__main__":
    key = jax.random.PRNGKey(0)

    # (B, T, forced batch tile): cover the lane-dense (T<128) transposed path,
    # the row-tiled (T>=128) path, non-multiple-of-8 batches, and the
    # cdiv-grid partial-last-block path on both layouts.
    cases = [
        ((8, 16), None),      # cols path, single full-extent block
        ((5, 16), None),      # cols path, B < 8 (full-dim block)
        ((16, 256), None),    # rows path, single full-extent block
        ((10, 256), None),    # rows path, B not a multiple of 8
        ((20, 256), 8),       # rows path, grid=3, partial last block
        ((200, 16), 128),     # cols path, grid=2, partial last block
    ]
    for i, ((B, T), tile) in enumerate(cases):
        k = jax.random.fold_in(key, i)
        logits = jax.random.normal(k, (B, T), dtype=jnp.float32)
        attn_s = jax.nn.softmax(logits, axis=1)        # row-stochastic, attention-like

        out = jax.block_until_ready(sparse_attention(attn_s, top_k=5, batch_tile=tile))
        ref = _sparse_attention_ref(attn_s, top_k=5)

        assert out.shape == (B, T) and out.dtype == jnp.float32
        assert jnp.allclose(out.astype(jnp.float32), ref, atol=1e-6, rtol=1e-6), (B, T)

    # Early-return branch: time_step <= top_k returns the input unchanged.
    small = jax.nn.softmax(jax.random.normal(key, (4, 6), dtype=jnp.float32), axis=1)
    out_small = jax.block_until_ready(sparse_attention(small, top_k=5))
    assert jnp.array_equal(out_small, small)

    print("KERNEL_OK")
</pallas_src>

<mosaic_0001>
module attributes {stable_mosaic.version = 11 : i64} {
  func.func @_sparse_attn_kernel_cols(%arg0: i32, %arg1: memref<8x16xf32, #tpu.memory_space<vmem>>, %arg2: memref<8x16xf32, #tpu.memory_space<vmem>>) attributes {dimension_semantics = [#tpu.dimension_semantics<parallel>], iteration_bounds = array<i64: 1>, scalar_prefetch = 0 : i64, scratch_operands = 0 : i64, tpu.core_type = #tpu.core_type<tc>, window_params = [{transform_indices = @transform_0, window_bounds = array<i64: 8, 16>}, {transform_indices = @transform_1, window_bounds = array<i64: 8, 16>}]} {
    %c0 = arith.constant 0 : index
    %c0_0 = arith.constant 0 : index
    %0 = vector.load %arg1[%c0, %c0_0] : memref<8x16xf32, #tpu.memory_space<vmem>>, vector<8x16xf32>
    %1 = tpu.transpose %0, [1, 0] : vector<8x16xf32> -> vector<16x8xf32>
    %cst = arith.constant 0.000000e+00 : f32
    %2 = vector.broadcast %cst : f32 to vector<1x8xf32>
    %cst_1 = arith.constant 0.000000e+00 : f32
    %3 = vector.broadcast %cst_1 : f32 to vector<1x8xf32>
    %cst_2 = arith.constant -3.40282347E+38 : f32
    %c0_i32 = arith.constant 0 : i32
    %cst_3 = arith.constant dense<0xFF800000> : vector<8xf32>
    %4 = vector.multi_reduction <maximumf>, %1, %cst_3 [0] : vector<16x8xf32> to vector<8xf32>
    %5 = vector.shape_cast %4 : vector<8xf32> to vector<1x8xf32>
    %6 = vector.broadcast %5 : vector<1x8xf32> to vector<16x8xf32>
    %7 = arith.cmpf oeq, %1, %6 : vector<16x8xf32>
    %8 = arith.extui %7 : vector<16x8xi1> to vector<16x8xi32>
    %9 = arith.sitofp %8 : vector<16x8xi32> to vector<16x8xf32>
    %cst_4 = arith.constant dense<0.000000e+00> : vector<8xf32>
    %10 = vector.multi_reduction <add>, %9, %cst_4 [0] : vector<16x8xf32> to vector<8xf32>
    %11 = vector.shape_cast %10 : vector<8xf32> to vector<1x8xf32>
    %12 = arith.addf %2, %11 : vector<1x8xf32>
    %cst_5 = arith.constant 6.000000e+00 : f32
    %13 = vector.broadcast %cst_5 : f32 to vector<1x8xf32>
    %14 = arith.cmpf olt, %2, %13 : vector<1x8xf32>
    %cst_6 = arith.constant 6.000000e+00 : f32
    %15 = vector.broadcast %cst_6 : f32 to vector<1x8xf32>
    %16 = arith.cmpf oge, %12, %15 : vector<1x8xf32>
    %17 = arith.andi %14, %16 : vector<1x8xi1>
    %18 = arith.select %17, %5, %3 : vector<1x8xi1>, vector<1x8xf32>
    %19 = vector.broadcast %cst_2 : f32 to vector<16x8xf32>
    %20 = arith.select %7, %19, %1 : vector<16x8xi1>, vector<16x8xf32>
    %c1_i32 = arith.constant 1 : i32
    %cst_7 = arith.constant dense<0xFF800000> : vector<8xf32>
    %21 = vector.multi_reduction <maximumf>, %20, %cst_7 [0] : vector<16x8xf32> to vector<8xf32>
    %22 = vector.shape_cast %21 : vector<8xf32> to vector<1x8xf32>
    %23 = vector.broadcast %22 : vector<1x8xf32> to vector<16x8xf32>
    %24 = arith.cmpf oeq, %20, %23 : vector<16x8xf32>
    %25 = arith.extui %24 : vector<16x8xi1> to vector<16x8xi32>
    %26 = arith.sitofp %25 : vector<16x8xi32> to vector<16x8xf32>
    %cst_8 = arith.constant dense<0.000000e+00> : vector<8xf32>
    %27 = vector.multi_reduction <add>, %26, %cst_8 [0] : vector<16x8xf32> to vector<8xf32>
    %28 = vector.shape_cast %27 : vector<8xf32> to vector<1x8xf32>
    %29 = arith.addf %12, %28 : vector<1x8xf32>
    %cst_9 = arith.constant 6.000000e+00 : f32
    %30 = vector.broadcast %cst_9 : f32 to vector<1x8xf32>
    %31 = arith.cmpf olt, %12, %30 : vector<1x8xf32>
    %cst_10 = arith.constant 6.000000e+00 : f32
    %32 = vector.broadcast %cst_10 : f32 to vector<1x8xf32>
    %33 = arith.cmpf oge, %29, %32 : vector<1x8xf32>
    %34 = arith.andi %31, %33 : vector<1x8xi1>
    %35 = arith.select %34, %22, %18 : vector<1x8xi1>, vector<1x8xf32>
    %36 = vector.broadcast %cst_2 : f32 to vector<16x8xf32>
    %37 = arith.select %24, %36, %20 : vector<16x8xi1>, vector<16x8xf32>
    %c2_i32 = arith.constant 2 : i32
    %cst_11 = arith.constant dense<0xFF800000> : vector<8xf32>
    %38 = vector.multi_reduction <maximumf>, %37, %cst_11 [0] : vector<16x8xf32> to vector<8xf32>
    %39 = vector.shape_cast %38 : vector<8xf32> to vector<1x8xf32>
    %40 = vector.broadcast %39 : vector<1x8xf32> to vector<16x8xf32>
    %41 = arith.cmpf oeq, %37, %40 : vector<16x8xf32>
    %42 = arith.extui %41 : vector<16x8xi1> to vector<16x8xi32>
    %43 = arith.sitofp %42 : vector<16x8xi32> to vector<16x8xf32>
    %cst_12 = arith.constant dense<0.000000e+00> : vector<8xf32>
    %44 = vector.multi_reduction <add>, %43, %cst_12 [0] : vector<16x8xf32> to vector<8xf32>
    %45 = vector.shape_cast %44 : vector<8xf32> to vector<1x8xf32>
    %46 = arith.addf %29, %45 : vector<1x8xf32>
    %cst_13 = arith.constant 6.000000e+00 : f32
    %47 = vector.broadcast %cst_13 : f32 to vector<1x8xf32>
    %48 = arith.cmpf olt, %29, %47 : vector<1x8xf32>
    %cst_14 = arith.constant 6.000000e+00 : f32
    %49 = vector.broadcast %cst_14 : f32 to vector<1x8xf32>
    %50 = arith.cmpf oge, %46, %49 : vector<1x8xf32>
    %51 = arith.andi %48, %50 : vector<1x8xi1>
    %52 = arith.select %51, %39, %35 : vector<1x8xi1>, vector<1x8xf32>
    %53 = vector.broadcast %cst_2 : f32 to vector<16x8xf32>
    %54 = arith.select %41, %53, %37 : vector<16x8xi1>, vector<16x8xf32>
    %c3_i32 = arith.constant 3 : i32
    %cst_15 = arith.constant dense<0xFF800000> : vector<8xf32>
    %55 = vector.multi_reduction <maximumf>, %54, %cst_15 [0] : vector<16x8xf32> to vector<8xf32>
    %56 = vector.shape_cast %55 : vector<8xf32> to vector<1x8xf32>
    %57 = vector.broadcast %56 : vector<1x8xf32> to vector<16x8xf32>
    %58 = arith.cmpf oeq, %54, %57 : vector<16x8xf32>
    %59 = arith.extui %58 : vector<16x8xi1> to vector<16x8xi32>
    %60 = arith.sitofp %59 : vector<16x8xi32> to vector<16x8xf32>
    %cst_16 = arith.constant dense<0.000000e+00> : vector<8xf32>
    %61 = vector.multi_reduction <add>, %60, %cst_16 [0] : vector<16x8xf32> to vector<8xf32>
    %62 = vector.shape_cast %61 : vector<8xf32> to vector<1x8xf32>
    %63 = arith.addf %46, %62 : vector<1x8xf32>
    %cst_17 = arith.constant 6.000000e+00 : f32
    %64 = vector.broadcast %cst_17 : f32 to vector<1x8xf32>
    %65 = arith.cmpf olt, %46, %64 : vector<1x8xf32>
    %cst_18 = arith.constant 6.000000e+00 : f32
    %66 = vector.broadcast %cst_18 : f32 to vector<1x8xf32>
    %67 = arith.cmpf oge, %63, %66 : vector<1x8xf32>
    %68 = arith.andi %65, %67 : vector<1x8xi1>
    %69 = arith.select %68, %56, %52 : vector<1x8xi1>, vector<1x8xf32>
    %70 = vector.broadcast %cst_2 : f32 to vector<16x8xf32>
    %71 = arith.select %58, %70, %54 : vector<16x8xi1>, vector<16x8xf32>
    %c4_i32 = arith.constant 4 : i32
    %cst_19 = arith.constant dense<0xFF800000> : vector<8xf32>
    %72 = vector.multi_reduction <maximumf>, %71, %cst_19 [0] : vector<16x8xf32> to vector<8xf32>
    %73 = vector.shape_cast %72 : vector<8xf32> to vector<1x8xf32>
    %74 = vector.broadcast %73 : vector<1x8xf32> to vector<16x8xf32>
    %75 = arith.cmpf oeq, %71, %74 : vector<16x8xf32>
    %76 = arith.extui %75 : vector<16x8xi1> to vector<16x8xi32>
    %77 = arith.sitofp %76 : vector<16x8xi32> to vector<16x8xf32>
    %cst_20 = arith.constant dense<0.000000e+00> : vector<8xf32>
    %78 = vector.multi_reduction <add>, %77, %cst_20 [0] : vector<16x8xf32> to vector<8xf32>
    %79 = vector.shape_cast %78 : vector<8xf32> to vector<1x8xf32>
    %80 = arith.addf %63, %79 : vector<1x8xf32>
    %cst_21 = arith.constant 6.000000e+00 : f32
    %81 = vector.broadcast %cst_21 : f32 to vector<1x8xf32>
    %82 = arith.cmpf olt, %63, %81 : vector<1x8xf32>
    %cst_22 = arith.constant 6.000000e+00 : f32
    %83 = vector.broadcast %cst_22 : f32 to vector<1x8xf32>
    %84 = arith.cmpf oge, %80, %83 : vector<1x8xf32>
    %85 = arith.andi %82, %84 : vector<1x8xi1>
    %86 = arith.select %85, %73, %69 : vector<1x8xi1>, vector<1x8xf32>
    %87 = vector.broadcast %cst_2 : f32 to vector<16x8xf32>
    %88 = arith.select %75, %87, %71 : vector<16x8xi1>, vector<16x8xf32>
    %c5_i32 = arith.constant 5 : i32
    %cst_23 = arith.constant dense<0xFF800000> : vector<8xf32>
    %89 = vector.multi_reduction <maximumf>, %88, %cst_23 [0] : vector<16x8xf32> to vector<8xf32>
    %90 = vector.shape_cast %89 : vector<8xf32> to vector<1x8xf32>
    %91 = vector.broadcast %90 : vector<1x8xf32> to vector<16x8xf32>
    %92 = arith.cmpf oeq, %88, %91 : vector<16x8xf32>
    %93 = arith.extui %92 : vector<16x8xi1> to vector<16x8xi32>
    %94 = arith.sitofp %93 : vector<16x8xi32> to vector<16x8xf32>
    %cst_24 = arith.constant dense<0.000000e+00> : vector<8xf32>
    %95 = vector.multi_reduction <add>, %94, %cst_24 [0] : vector<16x8xf32> to vector<8xf32>
    %96 = vector.shape_cast %95 : vector<8xf32> to vector<1x8xf32>
    %97 = arith.addf %80, %96 : vector<1x8xf32>
    %cst_25 = arith.constant 6.000000e+00 : f32
    %98 = vector.broadcast %cst_25 : f32 to vector<1x8xf32>
    %99 = arith.cmpf olt, %80, %98 : vector<1x8xf32>
    %cst_26 = arith.constant 6.000000e+00 : f32
    %100 = vector.broadcast %cst_26 : f32 to vector<1x8xf32>
    %101 = arith.cmpf oge, %97, %100 : vector<1x8xf32>
    %102 = arith.andi %99, %101 : vector<1x8xi1>
    %103 = arith.select %102, %90, %86 : vector<1x8xi1>, vector<1x8xf32>
    %104 = vector.broadcast %cst_2 : f32 to vector<16x8xf32>
    %105 = arith.select %92, %104, %88 : vector<16x8xi1>, vector<16x8xf32>
    %cst_27 = arith.constant 1.000000e-07 : f32
    %106 = vector.broadcast %cst_27 : f32 to vector<1x8xf32>
    %107 = arith.addf %103, %106 : vector<1x8xf32>
    %108 = vector.broadcast %107 : vector<1x8xf32> to vector<16x8xf32>
    %109 = arith.subf %1, %108 : vector<16x8xf32>
    %cst_28 = arith.constant 0.000000e+00 : f32
    %110 = vector.broadcast %cst_28 : f32 to vector<16x8xf32>
    %111 = arith.maximumf %109, %110 : vector<16x8xf32>
    %cst_29 = arith.constant dense<0.000000e+00> : vector<8xf32>
    %112 = vector.multi_reduction <add>, %111, %cst_29 [0] : vector<16x8xf32> to vector<8xf32>
    %113 = vector.shape_cast %112 : vector<8xf32> to vector<1x8xf32>
    %cst_30 = arith.constant 1.000000e-07 : f32
    %114 = vector.broadcast %cst_30 : f32 to vector<1x8xf32>
    %115 = arith.addf %113, %114 : vector<1x8xf32>
    %116 = tpu.reciprocal %115 : vector<1x8xf32> -> vector<1x8xf32>
    %117 = vector.broadcast %116 : vector<1x8xf32> to vector<16x8xf32>
    %118 = arith.mulf %111, %117 : vector<16x8xf32>
    %119 = tpu.transpose %118, [1, 0] : vector<16x8xf32> -> vector<8x16xf32>
    %c0_31 = arith.constant 0 : index
    %c0_32 = arith.constant 0 : index
    %120 = vector.load %arg2[%c0_31, %c0_32] : memref<8x16xf32, #tpu.memory_space<vmem>>, vector<8x16xf32>
    tpu.vector_store %arg2[%c0_31, %c0_32], %119 {strides = array<i32>} : memref<8x16xf32, #tpu.memory_space<vmem>>, vector<8x16xf32>,
    return
  }
  func.func @transform_0(%arg0: i32) -> (i32, i32) {
    %c0_i32 = arith.constant 0 : i32
    %c0_i32_0 = arith.constant 0 : i32
    return %arg0, %c0_i32 : i32, i32
  }
  func.func @transform_1(%arg0: i32) -> (i32, i32) {
    %c0_i32 = arith.constant 0 : i32
    %c0_i32_0 = arith.constant 0 : i32
    return %arg0, %c0_i32 : i32, i32
  }
}

</mosaic_0001>

<bundles_post_ra>
// kernel: tpu_custom_call.1
= control target key start
LH: loop header
LB: loop body
LE: loop exit
PB: predicated region body
PF: predicated region fallthrough
CT: control target
= control target key end

     0   :  { %6 = vsyncpa [#allocation3], 0  ;;  %s483_s0 = inlined_call_operand.hbm [shape: f32[8,16], index: 0, kind: input, shape index: {}]   ;;  %s484_s1 = inlined_call_operand.hbm [shape: f32[8,16], index: 1, kind: output, shape index: {}]  }
   0x1   :  { %7 = vsyncpa [#allocation4], 0  ;;  %s371_s6 = smov [#allocation2]   ;;  %s323_s10 = scalar_lea.hbm %s483_s0, 128 }
   0x2   :  { %s14_s7 = sshll.u32 %s371_s6, 4  ;;  %p324_p0 = scmp.ne.s32.totalorder %s483_s0, %s323_s10  ;;  %s15_s7 = int_to_ptr.vmem [resolvable:$true] %s14_s7 }
   0x3   :  { %p327_p1 = scmp.lt.u32.totalorder %s323_s10, %s483_s0 }
   0x5   :  { %p329_p2 = pnand %p327_p1, %p324_p0 }
   0x7   :  { %332 = shalt.err (!%p329_p2)
}
   0x8   :  { %s333_s15 = scalar_lea.vmem %s15_s7, 128  ;;  %p338_p4 = scmp.lt.s32.totalorder %s15_s7, %s15_s7 }
   0x9   :  { %p334_p3 = scmp.ne.s32.totalorder %s15_s7, %s333_s15  ;;  %p339_p5 = scmp.lt.s32.totalorder %s333_s15, %s333_s15 }
   0xb   :  { %p340_p6 = por %p339_p5, %p338_p4 }
   0xd   :  { %p341_p7 = pnand %p340_p6, %p334_p3 }
   0xf   :  { %344 = shalt.err (!%p341_p7)
}
  0x10   :  { %17 = dma.hbm_to_vmem [thread:$0]  %s483_s0, 128, %s15_s7, [#allocation3]  }
  0x11   :  { %367 = dma.done.wait [#allocation3], 128  }
  0x12   :  { %368 = vsyncadd [#allocation3], 4294967168  ;;  %v21_v0 = vld [vmem:[#allocation2] sm:$0xff]  ;;  %vm54_vm0 = vcmask 64512   ;;  %v372_v12 = vmov 0.0   ;;  %s373_s0 = smov [#allocation5]  }
  0x13   :  { %22 = vxpose.xlu0.b32.start.end [1/1] (short) (narrow) %v21_v0, 16  ;;  %s297_s18 = sshll.u32 %s373_s0, 4  ;;  %s298_s18 = int_to_ptr.vmem [resolvable:$true] %s297_s18 }
  0x14   :  { %s345_s19 = scalar_lea.vmem %s298_s18, 128  ;;  %p350_p9 = scmp.lt.s32.totalorder %s298_s18, %s298_s18 }
  0x15   :  { %p346_p8 = scmp.ne.s32.totalorder %s298_s18, %s345_s19  ;;  %p351_p10 = scmp.lt.s32.totalorder %s345_s19, %s345_s19 }
  0x17   :  { %p352_p11 = por %p351_p10, %p350_p9 }
  0x19   :  { %p353_p12 = pnand %p352_p11, %p346_p8 }
  0x93   :  { %v396_v1 = vpop.trf.xlu0 }
  0x94   :  { %v55_v3 = vsel %vm54_vm0, %v396_v1, -inf }
  0x97   :  { %v398_v2 = vpop.trf.xlu0 }
  0x98   :  { %v56_v4 = vsel %vm54_vm0, %v398_v2, -inf }
  0x99   :  { %v57_v5 = vmax.f32 %v55_v3, %v56_v4 }
  0x9b   :  { %v58_v6 = vrot.slane %v57_v5, 4 }
  0x9d   :  { %v59_v7 = vmax.f32 %v57_v5, %v58_v6 }
  0x9f   :  { %v60_v8 = vrot.slane %v59_v7, 2 }
  0xa1   :  { %v61_v9 = vmax.f32 %v59_v7, %v60_v8 }
  0xa3   :  { %v62_v10 = vrot.slane %v61_v9, 1 }
  0xa5   :  { %v63_v11 = vmax.f32 %v61_v9, %v62_v10 }
  0xa7   :  { %vm64_vm1 = vcmp.eq.f32.partialorder %v396_v1, %v63_v11  ;;  %vm65_vm2 = vcmp.eq.f32.partialorder %v398_v2, %v63_v11 }
  0xa8   :  { %v306_v13 = vsel %vm64_vm1, 1.0, %v372_v12  ;;  %v307_v14 = vsel %vm65_vm2, 1.0, %v372_v12  ;;  %v84_v15 = vsel %vm64_vm1, -3.4028235e+38, %v396_v1  ;;  %v85_v16 = vsel %vm65_vm2, -3.4028235e+38, %v398_v2 }
  0xa9   :  { %v70_v17 = vsel %vm54_vm0, %v306_v13, 0.0  ;;  %v71_v18 = vsel %vm54_vm0, %v307_v14, 0.0  ;;  %v86_v19 = vsel %vm54_vm0, %v84_v15, -inf  ;;  %v87_v20 = vsel %vm54_vm0, %v85_v16, -inf }
  0xaa   :  { %v72_v21 = vadd.f32 %v71_v18, %v70_v17  ;;  %v88_v22 = vmax.f32 %v86_v19, %v87_v20 }
  0xac   :  { %v73_v23 = vrot.slane %v72_v21, 4  ;;  %v89_v24 = vrot.slane %v88_v22, 4 }
  0xae   :  { %v74_v25 = vadd.f32 %v73_v23, %v72_v21  ;;  %v90_v26 = vmax.f32 %v88_v22, %v89_v24 }
  0xb0   :  { %v75_v27 = vrot.slane %v74_v25, 2  ;;  %v91_v28 = vrot.slane %v90_v26, 2 }
  0xb2   :  { %v76_v29 = vadd.f32 %v75_v27, %v74_v25  ;;  %v92_v30 = vmax.f32 %v90_v26, %v91_v28 }
  0xb4   :  { %v77_v31 = vrot.slane %v76_v29, 1  ;;  %v93_v32 = vrot.slane %v92_v30, 1 }
  0xb6   :  { %v78_v33 = vadd.f32 %v77_v31, %v76_v29  ;;  %v414_v34 = vmax.f32 %v92_v30, %v93_v32 }
  0xb8   :  { %vm81_vm3 = vcmp.ge.f32.partialorder %v78_v33, 6.0  ;;  %vm95_vm4 = vcmp.eq.f32.partialorder %v84_v15, %v414_v34  ;;  %vm96_vm5 = vcmp.eq.f32.partialorder %v85_v16, %v414_v34  ;;  %vm111_vm8 = vcmp.lt.f32.partialorder %v78_v33, 6.0 }
  0xb9   :  { %v418_v35 = vsel %vm81_vm3, %v63_v11, 0.0  ;;  %v308_v36 = vsel %vm95_vm4, 1.0, %v372_v12  ;;  %v309_v37 = vsel %vm96_vm5, 1.0, %v372_v12  ;;  %v115_v38 = vsel %vm95_vm4, -3.4028235e+38, %v84_v15 }
  0xba   :  { %v101_v39 = vsel %vm54_vm0, %v308_v36, 0.0  ;;  %v102_v40 = vsel %vm54_vm0, %v309_v37, 0.0  ;;  %v116_v41 = vsel %vm96_vm5, -3.4028235e+38, %v85_v16  ;;  %v117_v42 = vsel %vm54_vm0, %v115_v38, -inf }
  0xbb   :  { %v103_v43 = vadd.f32 %v102_v40, %v101_v39  ;;  %v118_v44 = vsel %vm54_vm0, %v116_v41, -inf }
  0xbc   :  { %v119_v45 = vmax.f32 %v117_v42, %v118_v44 }
  0xbd   :  { %v104_v46 = vrot.slane %v103_v43, 4 }
  0xbe   :  { %v120_v47 = vrot.slane %v119_v45, 4 }
  0xbf   :  { %v105_v48 = vadd.f32 %v104_v46, %v103_v43 }
  0xc0   :  { %v121_v49 = vmax.f32 %v119_v45, %v120_v47 }
  0xc1   :  { %v106_v50 = vrot.slane %v105_v48, 2 }
  0xc2   :  { %v122_v51 = vrot.slane %v121_v49, 2 }
  0xc3   :  { %v107_v52 = vadd.f32 %v106_v50, %v105_v48 }
  0xc4   :  { %v123_v53 = vmax.f32 %v121_v49, %v122_v51 }
  0xc5   :  { %v108_v54 = vrot.slane %v107_v52, 1 }
  0xc6   :  { %v124_v55 = vrot.slane %v123_v53, 1 }
  0xc7   :  { %v109_v56 = vadd.f32 %v108_v54, %v107_v52 }
  0xc8   :  { %v125_v57 = vmax.f32 %v123_v53, %v124_v55 }
  0xc9   :  { %v110_v58 = vadd.f32 %v109_v56, %v78_v33 }
  0xca   :  { %vm126_vm6 = vcmp.eq.f32.partialorder %v115_v38, %v125_v57  ;;  %vm127_vm7 = vcmp.eq.f32.partialorder %v116_v41, %v125_v57 }
  0xcb   :  { %vm112_vm9 = vcmp.ge.f32.partialorder %v110_v58, 6.0  ;;  %v310_v59 = vsel %vm126_vm6, 1.0, %v372_v12  ;;  %v311_v60 = vsel %vm127_vm7, 1.0, %v372_v12  ;;  %v146_v0 = vsel %vm126_vm6, -3.4028235e+38, %v115_v38 }
  0xcc   :  { %vm428_vm10 = vmand %vm111_vm8, %vm112_vm9  ;;  %v132_v62 = vsel %vm54_vm0, %v310_v59, 0.0  ;;  %v133_v63 = vsel %vm54_vm0, %v311_v60, 0.0  ;;  %v147_v3 = vsel %vm127_vm7, -3.4028235e+38, %v116_v41  ;;  %v148_v6 = vsel %vm54_vm0, %v146_v0, -inf }
  0xcd   :  { %v114_v4 = vsel %vm428_vm10, %v414_v34, %v418_v35  ;;  %v134_v5 = vadd.f32 %v133_v63, %v132_v62  ;;  %v149_v7 = vsel %vm54_vm0, %v147_v3, -inf  ;;  %vm142_vm13 = vcmp.lt.f32.partialorder %v110_v58, 6.0 }
  0xce   :  { %v150_v8 = vmax.f32 %v148_v6, %v149_v7 }
  0xcf   :  { %v135_v9 = vrot.slane %v134_v5, 4 }
  0xd0   :  { %v151_v10 = vrot.slane %v150_v8, 4 }
  0xd1   :  { %v136_v11 = vadd.f32 %v135_v9, %v134_v5 }
  0xd2   :  { %v152_v13 = vmax.f32 %v150_v8, %v151_v10 }
  0xd3   :  { %v137_v14 = vrot.slane %v136_v11, 2 }
  0xd4   :  { %v153_v15 = vrot.slane %v152_v13, 2 }
  0xd5   :  { %v138_v16 = vadd.f32 %v137_v14, %v136_v11 }
  0xd6   :  { %v154_v17 = vmax.f32 %v152_v13, %v153_v15 }
  0xd7   :  { %v139_v18 = vrot.slane %v138_v16, 1 }
  0xd8   :  { %v155_v19 = vrot.slane %v154_v17, 1 }
  0xd9   :  { %v140_v20 = vadd.f32 %v139_v18, %v138_v16 }
  0xda   :  { %v440_v21 = vmax.f32 %v154_v17, %v155_v19 }
  0xdb   :  { %v141_v22 = vadd.f32 %v140_v20, %v110_v58 }
  0xdc   :  { %vm157_vm11 = vcmp.eq.f32.partialorder %v146_v0, %v440_v21  ;;  %vm158_vm12 = vcmp.eq.f32.partialorder %v147_v3, %v440_v21 }
  0xdd   :  { %vm143_vm14 = vcmp.ge.f32.partialorder %v141_v22, 6.0  ;;  %v312_v23 = vsel %vm157_vm11, 1.0, %v372_v12  ;;  %v313_v24 = vsel %vm158_vm12, 1.0, %v372_v12  ;;  %v177_v27 = vsel %vm157_vm11, -3.4028235e+38, %v146_v0 }
  0xde   :  { %vm144_vm15 = vmand %vm142_vm13, %vm143_vm14  ;;  %v163_v25 = vsel %vm54_vm0, %v312_v23, 0.0  ;;  %v164_v26 = vsel %vm54_vm0, %v313_v24, 0.0  ;;  %v178_v28 = vsel %vm158_vm12, -3.4028235e+38, %v147_v3  ;;  %v179_v31 = vsel %vm54_vm0, %v177_v27, -inf }
  0xdf   :  { %v145_v29 = vsel %vm144_vm15, %v125_v57, %v114_v4  ;;  %v165_v30 = vadd.f32 %v164_v26, %v163_v25  ;;  %v180_v32 = vsel %vm54_vm0, %v178_v28, -inf  ;;  %vm173_vm3 = vcmp.lt.f32.partialorder %v141_v22, 6.0 }
  0xe0   :  { %v181_v33 = vmax.f32 %v179_v31, %v180_v32  ;;  %vm289_vm14 = vcmask 130048  }
  0xe1   :  { %v166_v34 = vrot.slane %v165_v30, 4 }
  0xe2   :  { %v182_v35 = vrot.slane %v181_v33, 4 }
  0xe3   :  { %v167_v36 = vadd.f32 %v166_v34, %v165_v30 }
  0xe4   :  { %v183_v37 = vmax.f32 %v181_v33, %v182_v35 }
  0xe5   :  { %v168_v38 = vrot.slane %v167_v36, 2 }
  0xe6   :  { %v184_v39 = vrot.slane %v183_v37, 2 }
  0xe7   :  { %v169_v40 = vadd.f32 %v168_v38, %v167_v36 }
  0xe8   :  { %v185_v41 = vmax.f32 %v183_v37, %v184_v39 }
  0xe9   :  { %v170_v42 = vrot.slane %v169_v40, 1 }
  0xea   :  { %v186_v43 = vrot.slane %v185_v41, 1 }
  0xeb   :  { %v171_v44 = vadd.f32 %v170_v42, %v169_v40 }
  0xec   :  { %v187_v45 = vmax.f32 %v185_v41, %v186_v43 }
  0xed   :  { %v172_v46 = vadd.f32 %v171_v44, %v141_v22 }
  0xee   :  { %vm188_vm1 = vcmp.eq.f32.partialorder %v177_v27, %v187_v45  ;;  %vm189_vm2 = vcmp.eq.f32.partialorder %v178_v28, %v187_v45 }
  0xef   :  { %vm174_vm4 = vcmp.ge.f32.partialorder %v172_v46, 6.0  ;;  %v314_v47 = vsel %vm188_vm1, 1.0, %v372_v12  ;;  %v315_v48 = vsel %vm189_vm2, 1.0, %v372_v12  ;;  %v208_v52 = vsel %vm188_vm1, -3.4028235e+38, %v177_v27 }
  0xf0   :  { %vm452_vm5 = vmand %vm173_vm3, %vm174_vm4  ;;  %v194_v50 = vsel %vm54_vm0, %v314_v47, 0.0  ;;  %v195_v51 = vsel %vm54_vm0, %v315_v48, 0.0  ;;  %v209_v53 = vsel %vm189_vm2, -3.4028235e+38, %v178_v28  ;;  %v210_v56 = vsel %vm54_vm0, %v208_v52, -inf }
  0xf1   :  { %v176_v54 = vsel %vm452_vm5, %v440_v21, %v145_v29  ;;  %v196_v55 = vadd.f32 %v195_v51, %v194_v50  ;;  %v211_v57 = vsel %vm54_vm0, %v209_v53, -inf  ;;  %vm204_vm8 = vcmp.lt.f32.partialorder %v172_v46, 6.0 }
  0xf2   :  { %v212_v58 = vmax.f32 %v210_v56, %v211_v57 }
  0xf3   :  { %v197_v59 = vrot.slane %v196_v55, 4 }
  0xf4   :  { %v213_v60 = vrot.slane %v212_v58, 4 }
  0xf5   :  { %v198_v61 = vadd.f32 %v197_v59, %v196_v55 }
  0xf6   :  { %v214_v62 = vmax.f32 %v212_v58, %v213_v60 }
  0xf7   :  { %v199_v63 = vrot.slane %v198_v61, 2 }
  0xf8   :  { %v215_v0 = vrot.slane %v214_v62, 2 }
  0xf9   :  { %v200_v3 = vadd.f32 %v199_v63, %v198_v61 }
  0xfa   :  { %v216_v4 = vmax.f32 %v214_v62, %v215_v0 }
  0xfb   :  { %v201_v5 = vrot.slane %v200_v3, 1 }
  0xfc   :  { %v217_v6 = vrot.slane %v216_v4, 1 }
  0xfd   :  { %v202_v7 = vadd.f32 %v201_v5, %v200_v3 }
  0xfe   :  { %v218_v8 = vmax.f32 %v216_v4, %v217_v6 }
  0xff   :  { %v203_v9 = vadd.f32 %v202_v7, %v172_v46 }
 0x100   :  { %vm219_vm6 = vcmp.eq.f32.partialorder %v208_v52, %v218_v8  ;;  %vm220_vm7 = vcmp.eq.f32.partialorder %v209_v53, %v218_v8 }
 0x101   :  { %vm205_vm9 = vcmp.ge.f32.partialorder %v203_v9, 6.0  ;;  %v316_v10 = vsel %vm219_vm6, 1.0, %v372_v12  ;;  %v317_v11 = vsel %vm220_vm7, 1.0, %v372_v12  ;;  %vm235_vm11 = vcmp.lt.f32.partialorder %v203_v9, 6.0 }
 0x102   :  { %vm206_vm10 = vmand %vm204_vm8, %vm205_vm9  ;;  %v225_v13 = vsel %vm54_vm0, %v316_v10, 0.0  ;;  %v226_v14 = vsel %vm54_vm0, %v317_v11, 0.0 }
 0x103   :  { %v207_v15 = vsel %vm206_vm10, %v187_v45, %v176_v54  ;;  %v227_v16 = vadd.f32 %v226_v14, %v225_v13 }
 0x105   :  { %v228_v17 = vrot.slane %v227_v16, 4 }
 0x107   :  { %v229_v18 = vadd.f32 %v228_v17, %v227_v16 }
 0x109   :  { %v230_v19 = vrot.slane %v229_v18, 2 }
 0x10b   :  { %v231_v20 = vadd.f32 %v230_v19, %v229_v18 }
 0x10d   :  { %v232_v21 = vrot.slane %v231_v20, 1 }
 0x10f   :  { %v233_v22 = vadd.f32 %v232_v21, %v231_v20 }
 0x111   :  { %v234_v23 = vadd.f32 %v233_v22, %v203_v9 }
 0x113   :  { %vm236_vm12 = vcmp.ge.f32.partialorder %v234_v23, 6.0 }
 0x114   :  { %vm237_vm13 = vmand %vm235_vm11, %vm236_vm12 }
 0x115   :  { %v238_v24 = vsel %vm237_vm13, %v218_v8, %v207_v15 }
 0x116   :  { %v239_v25 = vadd.f32 1e-07, %v238_v24 }
 0x118   :  { %v241_v12 = vsub.f32 %v398_v2, %v239_v25  ;;  %v240_v26 = vsub.f32 %v396_v1, %v239_v25 }
 0x11a   :  { %v243_v27 = vmax.f32 %v241_v12, 0.0  ;;  %v242_v28 = vmax.f32 %v240_v26, 0.0 }
 0x11c   :  { %v244_v29 = vsel %vm54_vm0, %v242_v28, 0.0  ;;  %v245_v30 = vsel %vm54_vm0, %v243_v27, 0.0 }
 0x11d   :  { %v246_v31 = vadd.f32 %v245_v30, %v244_v29 }
 0x11f   :  { %v247_v32 = vrot.slane %v246_v31, 4 }
 0x121   :  { %v248_v33 = vadd.f32 %v247_v32, %v246_v31 }
 0x123   :  { %v249_v34 = vrot.slane %v248_v33, 2 }
 0x125   :  { %v250_v35 = vadd.f32 %v249_v34, %v248_v33 }
 0x127   :  { %v251_v36 = vrot.slane %v250_v35, 1 }
 0x129   :  { %v252_v37 = vadd.f32 %v251_v36, %v250_v35 }
 0x12b   :  { %v253_v38 = vadd.f32 1e-07, %v252_v37 }
 0x12d   :  { %321 = vrcp.f32 %v253_v38 }
 0x137   :  { %v322_v39 = vpop.eup %321 }
 0x138   :  { %v255_v40 = vmul.f32 %v322_v39, %v242_v28  ;;  %v256_v2 = vmul.f32 %v322_v39, %v243_v27 }
 0x13a   :  { %257 = vxpose.xlu0.b32.start [1/2] (short) (narrow) %v255_v40, 8 }
 0x13e   :  { %258 = vxpose.xlu0.b32.end [2/2] (short) (narrow) %v256_v2, 8 }
 0x1ba   :  { %v273_v1 = vpop.trf.xlu0 }
 0x1bb   :  { %290 = vst.msk [vmem:[#allocation5] sm:$0xff] %vm289_vm14, %v273_v1 }
 0x1bc   :  { %356 = shalt.err (!%p353_p12)
}
 0x1bd   :  { %s357_s22 = scalar_lea.hbm %s484_s1, 128 }
 0x1be   :  { %p358_p13 = scmp.ne.s32.totalorder %s484_s1, %s357_s22  ;;  %p361_p0 = scmp.lt.u32.totalorder %s357_s22, %s484_s1 }
 0x1c0   :  { %p363_p1 = pnand %p361_p0, %p358_p13 }
 0x1c2   :  { %366 = shalt.err (!%p363_p1)
}
 0x1c3   :  { %300 = dma.vmem_to_hbm [thread:$0]  %s298_s18, 128, %s484_s1, [#allocation4]  }
 0x1c4   :  { %369 = dma.done.wait [#allocation4], 128  }
 0x1c5   :  { %370 = vsyncadd [#allocation4], 4294967168 }
 0x1c6   :  { %304 = vsyncpa [#allocation3], 1 }
 0x1c7   :  { %305 = vsyncpa [#allocation4], 1 }

</bundles_post_ra>
